<compile_context>
chip_gen: v7x
topology: tpu7x:2x2x1
jax: 0.10.0
libtpu: 0.0.40
codegen_flags: <defaults>
</compile_context>

<pallas_src>
import math

import jax
import jax.numpy as jnp
from jax.experimental import pallas as pl
from jax.experimental.pallas import tpu as pltpu


def _round_up(v, m):
    return ((v + m - 1) // m) * m


def _pad_to(a, shape, dtype):
    pads = [(0, s - d) for d, s in zip(a.shape, shape)]
    return jnp.pad(a.astype(dtype), pads)


def _pick_tile(n_pad, target):
    """Largest multiple of 128 that divides n_pad and is <= min(target, n_pad)."""
    t = min(target, n_pad)
    t = (t // 128) * 128
    t = max(t, 128)
    while n_pad % t != 0:
        t -= 128
    return t


def _graph_conv_kernel(xw_ref, f_ref, b_ref, o_ref):
    k = pl.program_id(1)

    # Output block is resident across the reduction axis (its index_map returns
    # the same block for every k). Init it with the broadcast bias, then
    # accumulate the filter-tile matmul directly into it in f32.
    @pl.when(k == 0)
    def _init():
        o_ref[...] = jnp.zeros_like(o_ref) + b_ref[...]

    o_ref[...] += jnp.dot(
        f_ref[...], xw_ref[...], preferred_element_type=jnp.float32
    )


def graph_conv(x, weight, flt, bias=None, *, tm_target=512, tk_target=2048):
    """out = flt @ (x @ weight) + bias (f32 result, bf16 streamed operands)."""
    n, in_features = x.shape
    out_features = weight.shape[1]

    # Lane-dense output: pad out_features to a multiple of 128.
    f_pad = _round_up(out_features, 128)
    # Pad N only to the (8,128) layout granularity, NOT to the tile size.
    n_pad = _round_up(n, 128)

    # Decoupled row / reduction tiles (largest 128-multiples dividing n_pad).
    tm = _pick_tile(n_pad, tm_target)
    tk = _pick_tile(n_pad, tk_target)

    # Precompute x @ W once in f32, then cast to bf16 for streaming.
    # (One extra bf16 rounding step on xw; error stays well within tolerance.)
    xw = jnp.dot(x.astype(jnp.float32), weight.astype(jnp.float32))
    xw_p = _pad_to(xw, (n_pad, f_pad), jnp.bfloat16)
    flt_p = _pad_to(flt, (n_pad, n_pad), jnp.bfloat16)
    if bias is None:
        b_p = jnp.zeros((1, f_pad), jnp.float32)
    else:
        b_p = _pad_to(bias.reshape(1, out_features), (1, f_pad), jnp.float32)

    grid = (n_pad // tm, n_pad // tk)  # (row tiles, reduction tiles) — reduction last

    # VMEM budget: double-buffered filter + xw tiles, resident/writeback output,
    # bias, plus ~50% headroom. Capped below v7x's 64 MiB physical per-TC VMEM.
    working = (
        2 * tm * tk * 2        # filter tiles, bf16, double-buffered
        + 2 * tk * f_pad * 2   # xw tiles, bf16, double-buffered
        + 2 * tm * f_pad * 4   # output block (resident + writeback), f32
        + 2 * f_pad * 4        # bias
    )
    vmem_limit = int(working * 1.5) + (4 << 20)
    vmem_limit = min(max(vmem_limit, 16 << 20), 60 << 20)

    out_p = pl.pallas_call(
        _graph_conv_kernel,
        out_shape=jax.ShapeDtypeStruct((n_pad, f_pad), jnp.float32),
        grid_spec=pltpu.PrefetchScalarGridSpec(
            num_scalar_prefetch=0,
            grid=grid,
            in_specs=[
                pl.BlockSpec((tk, f_pad), lambda i, k: (k, 0)),   # xw reduction slice
                pl.BlockSpec((tm, tk), lambda i, k: (i, k)),      # filter tile
                pl.BlockSpec((1, f_pad), lambda i, k: (0, 0)),    # bias (tiny, resident)
            ],
            out_specs=pl.BlockSpec((tm, f_pad), lambda i, k: (i, 0)),
        ),
        compiler_params=pltpu.CompilerParams(
            dimension_semantics=("parallel", "arbitrary"),
            vmem_limit_bytes=vmem_limit,
        ),
    )(xw_p, flt_p, b_p)

    return out_p[:n, :out_features]


def init_graph_conv_params(key, in_features, out_features, use_bias=True):
    """Deterministic init mirroring GraphConv.reset_parameters shapes/semantics."""
    k_w, k_b = jax.random.split(key)
    # kaiming_uniform_(weight, a=sqrt(5)) on an (in, out) tensor:
    # PyTorch fan_in = weight.size(1) = out_features; bound = 1/sqrt(fan_in)
    fan_in = out_features
    w_bound = math.sqrt(6.0 / ((1.0 + 5.0) * fan_in))
    weight = jax.random.uniform(
        k_w, (in_features, out_features), jnp.float32, -w_bound, w_bound
    )
    if use_bias:
        b_bound = 1.0 / math.sqrt(fan_in) if fan_in > 0 else 0.0
        bias = jax.random.uniform(
            k_b, (out_features,), jnp.float32, -b_bound, b_bound
        )
    else:
        bias = None
    return weight, bias


if __name__ == "__main__":
    key = jax.random.PRNGKey(0)
    k_params, k_x, k_f = jax.random.split(key, 3)

    N = 256            # number of graph nodes
    in_features = 32
    out_features = 16

    weight, bias = init_graph_conv_params(k_params, in_features, out_features, use_bias=True)

    x = jax.random.normal(k_x, (N, in_features), jnp.float32)
    # symmetric, scaled graph filter (dense adjacency-like matrix)
    a = jax.random.uniform(k_f, (N, N), jnp.float32)
    flt = (a + a.T) / (2.0 * N)

    out = graph_conv(x, weight, flt, bias)
    out = jax.block_until_ready(out)

    # reference in plain f32 JAX (kernel streams bf16 operands -> loose tolerance)
    ref = flt @ (x @ weight) + bias[None, :]
    assert out.shape == (N, out_features)
    assert jnp.allclose(out, ref, atol=5e-2, rtol=5e-2), float(
        jnp.max(jnp.abs(out - ref))
    )

    print("KERNEL_OK")
</pallas_src>

<mosaic_0001>
module attributes {stable_mosaic.version = 11 : i64} {
  func.func @_graph_conv_kernel(%arg0: i32, %arg1: i32, %arg2: memref<256x128xbf16, #tpu.memory_space<vmem>>, %arg3: memref<256x256xbf16, #tpu.memory_space<vmem>>, %arg4: memref<1x128xf32, #tpu.memory_space<vmem>>, %arg5: memref<256x128xf32, #tpu.memory_space<vmem>>) attributes {dimension_semantics = [#tpu.dimension_semantics<parallel>, #tpu.dimension_semantics<arbitrary>], iteration_bounds = array<i64: 1, 1>, scalar_prefetch = 0 : i64, scratch_operands = 0 : i64, tpu.core_type = #tpu.core_type<tc>, window_params = [{transform_indices = @transform_0, window_bounds = array<i64: 256, 128>}, {transform_indices = @transform_1, window_bounds = array<i64: 256, 256>}, {pipeline_mode = #tpu.pipeline_mode<synchronous>, transform_indices = @transform_2, window_bounds = array<i64: 1, 128>}, {transform_indices = @transform_3, window_bounds = array<i64: 256, 128>}]} {
    %c0_i32 = arith.constant 0 : i32
    %0 = arith.cmpi eq, %arg1, %c0_i32 : i32
    %1 = arith.extui %0 : i1 to i32
    %c0_i32_0 = arith.constant 0 : i32
    %2 = arith.cmpi ne, %1, %c0_i32_0 : i32
    scf.if %2 {
      %cst_8 = arith.constant 0.000000e+00 : f32
      %9 = vector.broadcast %cst_8 : f32 to vector<256x128xf32>
      %c0_9 = arith.constant 0 : index
      %c0_10 = arith.constant 0 : index
      %10 = vector.load %arg4[%c0_9, %c0_10] : memref<1x128xf32, #tpu.memory_space<vmem>>, vector<1x128xf32>
      %11 = vector.broadcast %10 : vector<1x128xf32> to vector<256x128xf32>
      %12 = arith.addf %9, %11 : vector<256x128xf32>
      %c0_11 = arith.constant 0 : index
      %c0_12 = arith.constant 0 : index
      %13 = vector.load %arg5[%c0_11, %c0_12] : memref<256x128xf32, #tpu.memory_space<vmem>>, vector<256x128xf32>
      tpu.vector_store %arg5[%c0_11, %c0_12], %12 {strides = array<i32>} : memref<256x128xf32, #tpu.memory_space<vmem>>, vector<256x128xf32>,
    } else {
    }
    %c0 = arith.constant 0 : index
    %c0_1 = arith.constant 0 : index
    %3 = vector.load %arg5[%c0, %c0_1] : memref<256x128xf32, #tpu.memory_space<vmem>>, vector<256x128xf32>
    %c0_2 = arith.constant 0 : index
    %c0_3 = arith.constant 0 : index
    %4 = vector.load %arg3[%c0_2, %c0_3] : memref<256x256xbf16, #tpu.memory_space<vmem>>, vector<256x256xbf16>
    %c0_4 = arith.constant 0 : index
    %c0_5 = arith.constant 0 : index
    %5 = vector.load %arg2[%c0_4, %c0_5] : memref<256x128xbf16, #tpu.memory_space<vmem>>, vector<256x128xbf16>
    %cst = arith.constant dense<0.000000e+00> : vector<256x128xf32>
    %6 = tpu.matmul %4, %5, %cst {dimension_numbers = #tpu.dot_dimension_numbers<[1], [0], [0], [1], [0, 0, 1, 1], [], []>} : vector<256x256xbf16>, vector<256x128xbf16>, vector<256x128xf32> -> vector<256x128xf32>
    %7 = arith.addf %3, %6 : vector<256x128xf32>
    %c0_6 = arith.constant 0 : index
    %c0_7 = arith.constant 0 : index
    %8 = vector.load %arg5[%c0_6, %c0_7] : memref<256x128xf32, #tpu.memory_space<vmem>>, vector<256x128xf32>
    tpu.vector_store %arg5[%c0_6, %c0_7], %7 {strides = array<i32>} : memref<256x128xf32, #tpu.memory_space<vmem>>, vector<256x128xf32>,
    return
  }
  func.func @transform_0(%arg0: i32, %arg1: i32) -> (i32, i32) {
    %c0_i32 = arith.constant 0 : i32
    %c0_i32_0 = arith.constant 0 : i32
    return %arg1, %c0_i32 : i32, i32
  }
  func.func @transform_1(%arg0: i32, %arg1: i32) -> (i32, i32) {
    %c0_i32 = arith.constant 0 : i32
    return %arg0, %arg1 : i32, i32
  }
  func.func @transform_2(%arg0: i32, %arg1: i32) -> (i32, i32) {
    %c0_i32 = arith.constant 0 : i32
    %c0_i32_0 = arith.constant 0 : i32
    %c0_i32_1 = arith.constant 0 : i32
    return %c0_i32, %c0_i32_0 : i32, i32
  }
  func.func @transform_3(%arg0: i32, %arg1: i32) -> (i32, i32) {
    %c0_i32 = arith.constant 0 : i32
    %c0_i32_0 = arith.constant 0 : i32
    return %arg0, %c0_i32 : i32, i32
  }
}

</mosaic_0001>

<bundles_post_ra>
// kernel: tpu_custom_call.1
= control target key start
LH: loop header
LB: loop body
LE: loop exit
PB: predicated region body
PF: predicated region fallthrough
CT: control target
= control target key end

     0   :  { %8 = vsyncpa [#allocation3], 0  ;;  %s1109_s0 = inlined_call_operand.hbm [shape: bf16[256,128], index: 0, kind: input, shape index: {}]   ;;  %s1110_s1 = inlined_call_operand.hbm [shape: bf16[256,256], index: 1, kind: input, shape index: {}]   ;;  %s1111_s2 = inlined_call_operand.vmem [shape: f32[1,128], index: 2, kind: input, shape index: {}]   ;;  %s1112_s3 = inlined_call_operand.hbm [shape: f32[256,128], index: 3, kind: output, shape index: {}]  }
   0x1   :  { %9 = vsyncpa [#allocation6], 0 }
   0x2   :  { %10 = vsyncpa [#allocation4], 0  ;;  %s1003_s12 = smov [#allocation2]   ;;  %s931_s16 = scalar_lea.hbm %s1109_s0, 2048 }
   0x3   :  { %s16_s13 = sshll.u32 %s1003_s12, 4  ;;  %p932_p0 = scmp.ne.s32.totalorder %s1109_s0, %s931_s16  ;;  %s17_s13 = int_to_ptr.vmem [resolvable:$true] %s16_s13 }
   0x4   :  { %p935_p1 = scmp.lt.u32.totalorder %s931_s16, %s1109_s0 }
   0x6   :  { %p937_p2 = pnand %p935_p1, %p932_p0 }
   0x8   :  { %940 = shalt.err (!%p937_p2)
}
   0x9   :  { %s941_s21 = scalar_lea.vmem %s17_s13, 2048  ;;  %p946_p4 = scmp.lt.s32.totalorder %s17_s13, %s17_s13 }
   0xa   :  { %p942_p3 = scmp.ne.s32.totalorder %s17_s13, %s941_s21  ;;  %p947_p5 = scmp.lt.s32.totalorder %s941_s21, %s941_s21 }
   0xc   :  { %p948_p6 = por %p947_p5, %p946_p4 }
   0xe   :  { %p949_p7 = pnand %p948_p6, %p942_p3 }
  0x10   :  { %952 = shalt.err (!%p949_p7)
}
  0x11   :  { %s1004_s22 = smov 64   ;;  %s1005_s23 = smov 4  }
  0x12   :  { %22 = dma.hbm_to_vmem [thread:$0]  %s1109_s0, 2048, %s17_s13, [#allocation3], %s1004_s22, %s1004_s22, %s1005_s23  }
  0x13   :  { %s1006_s26 = smov [#allocation5]   ;;  %s953_s30 = scalar_lea.hbm %s1110_s1, 4096 }
  0x14   :  { %s28_s27 = sshll.u32 %s1006_s26, 4  ;;  %p954_p8 = scmp.ne.s32.totalorder %s1110_s1, %s953_s30  ;;  %s29_s27 = int_to_ptr.vmem [resolvable:$true] %s28_s27 }
  0x15   :  { %p957_p9 = scmp.lt.u32.totalorder %s953_s30, %s1110_s1 }
  0x17   :  { %p959_p10 = pnand %p957_p9, %p954_p8 }
  0x19   :  { %962 = shalt.err (!%p959_p10)
}
  0x1a   :  { %s963_s8 = scalar_lea.vmem %s29_s27, 4096  ;;  %p968_p12 = scmp.lt.s32.totalorder %s29_s27, %s29_s27 }
  0x1b   :  { %p964_p11 = scmp.ne.s32.totalorder %s29_s27, %s963_s8  ;;  %p969_p13 = scmp.lt.s32.totalorder %s963_s8, %s963_s8 }
  0x1d   :  { %p970_p0 = por %p969_p13, %p968_p12 }
  0x1f   :  { %p971_p1 = pnand %p970_p0, %p964_p11 }
  0x21   :  { %974 = shalt.err (!%p971_p1)
}
  0x22   :  { %s1007_s0 = smov 128   ;;  %s1008_s9 = smov 8  }
  0x23   :  { %34 = dma.hbm_to_vmem [thread:$0]  %s1110_s1, 4096, %s29_s27, [#allocation6], %s1007_s0, %s1007_s0, %s1008_s9  }
  0x24   :  { %997 = dma.done.wait [#allocation3], 2048  }
  0x25   :  { %998 = vsyncadd [#allocation3], 4294965248 }
  0x26   :  { %999 = dma.done.wait [#allocation6], 4096  }
  0x27   :  { %1000 = vsyncadd [#allocation6], 4294963200  ;;  %v867_v0 = vld [vmem:[#allocation2 + $0x40] sm:$0xff]   ;;  %v869_v2 = vld [vmem:[#allocation2 + $0x48] sm:$0xff]  }
  0x28   :  { %v868_v1 = vld [vmem:[#allocation2] sm:$0xff]   ;;  %732 = vmatprep.subr.bf16.mxu0 %v867_v0  ;;  %844 = vmatprep.subr.bf16.mxu1 %v867_v0  ;;  %v870_v3 = vld [vmem:[#allocation2 + $0x8] sm:$0xff]   ;;  %v871_v4 = vld [vmem:[#allocation2 + $0x50] sm:$0xff]  }
  0x29   :  { %733 = vmatpush3.bf16.msra.mxu0 %v868_v1  ;;  %852 = vmatpush3.bf16.msra.mxu1 %v868_v1  ;;  %v872_v5 = vld [vmem:[#allocation2 + $0x10] sm:$0xff]   ;;  %v873_v6 = vld [vmem:[#allocation2 + $0x58] sm:$0xff]   ;;  %v875_v8 = vld [vmem:[#allocation2 + $0x60] sm:$0xff]  }
  0x2a   :  { %734 = vmatprep.subr.bf16.mxu0 %v869_v2  ;;  %845 = vmatprep.subr.bf16.mxu1 %v869_v2  ;;  %v874_v7 = vld [vmem:[#allocation2 + $0x18] sm:$0xff]   ;;  %v876_v9 = vld [vmem:[#allocation2 + $0x20] sm:$0xff]   ;;  %v877_v10 = vld [vmem:[#allocation2 + $0x68] sm:$0xff]  }
  0x2b   :  { %v885_v11 = vld [vmem:[#allocation5 + $0x4] ss:$8 sps:$4 sm:$0xff]   ;;  %v879_v14 = vld [vmem:[#allocation2 + $0x70] sm:$0xff]   ;;  %v881_v16 = vld [vmem:[#allocation2 + $0x78] sm:$0xff]  }
  0x2c   :  { %v888_v12 = vld [vmem:[#allocation5 + $0x84] ss:$8 sps:$4 sm:$0xff]   ;;  %472 = vmatprep.mubr.bf16.mxu0 %v885_v11  ;;  %v880_v15 = vld [vmem:[#allocation2 + $0x30] sm:$0xff]   ;;  %v882_v17 = vld [vmem:[#allocation2 + $0x38] sm:$0xff]  }
  0x2d   :  { %735 = vmatpush3.bf16.msra.mxu0 %v870_v3  ;;  %853 = vmatpush3.bf16.msra.mxu1 %v870_v3  ;;  %v878_v13 = vld [vmem:[#allocation2 + $0x28] sm:$0xff]   ;;  %v889_v20 = vld [vmem:[#allocation5 + $0x14] ss:$8 sps:$4 sm:$0xff]   ;;  %v893_v22 = vld [vmem:[#allocation5 + $0x10] ss:$8 sps:$4 sm:$0xff]  }
  0x2e   :  { %736 = vmatprep.subr.bf16.mxu0 %v871_v4  ;;  %846 = vmatprep.subr.bf16.mxu1 %v871_v4  ;;  %v883_v18 = vld [vmem:[#allocation5] ss:$8 sps:$4 sm:$0xff]   ;;  %v891_v21 = vld [vmem:[#allocation5 + $0x94] ss:$8 sps:$4 sm:$0xff]   ;;  %v894_v23 = vld [vmem:[#allocation5 + $0x90] ss:$8 sps:$4 sm:$0xff]  }
  0x2f   :  { %536 = vmatprep.mubr.bf16.mxu1 %v888_v12  ;;  %v886_v19 = vld [vmem:[#allocation5 + $0x80] ss:$8 sps:$4 sm:$0xff]   ;;  %v895_v24 = vld [vmem:[#allocation5 + $0x24] ss:$8 sps:$4 sm:$0xff]   ;;  %v901_v28 = vld [vmem:[#allocation5 + $0x34] ss:$8 sps:$4 sm:$0xff]  }
  0x30   :  { %v897_v25 = vld [vmem:[#allocation5 + $0xa4] ss:$8 sps:$4 sm:$0xff]   ;;  %v899_v26 = vld [vmem:[#allocation5 + $0x20] ss:$8 sps:$4 sm:$0xff]   ;;  %v903_v29 = vld [vmem:[#allocation5 + $0xb4] ss:$8 sps:$4 sm:$0xff]  }
  0x31   :  { %737 = vmatpush3.bf16.msra.mxu0 %v872_v5  ;;  %854 = vmatpush3.bf16.msra.mxu1 %v872_v5  ;;  %v900_v27 = vld [vmem:[#allocation5 + $0xa0] ss:$8 sps:$4 sm:$0xff]   ;;  %v905_v30 = vld [vmem:[#allocation5 + $0x30] ss:$8 sps:$4 sm:$0xff]   ;;  %v907_v32 = vld [vmem:[#allocation5 + $0x44] ss:$8 sps:$4 sm:$0xff]  }
  0x32   :  { %738 = vmatprep.subr.bf16.mxu0 %v873_v6  ;;  %847 = vmatprep.subr.bf16.mxu1 %v873_v6  ;;  %v906_v31 = vld [vmem:[#allocation5 + $0xb0] ss:$8 sps:$4 sm:$0xff]   ;;  %v909_v33 = vld [vmem:[#allocation5 + $0xc4] ss:$8 sps:$4 sm:$0xff]   ;;  %v911_v34 = vld [vmem:[#allocation5 + $0x40] ss:$8 sps:$4 sm:$0xff]  }
  0x33   :  { %v912_v35 = vld [vmem:[#allocation5 + $0xc0] ss:$8 sps:$4 sm:$0xff]   ;;  %v913_v36 = vld [vmem:[#allocation5 + $0x54] ss:$8 sps:$4 sm:$0xff]   ;;  %v917_v38 = vld [vmem:[#allocation5 + $0x50] ss:$8 sps:$4 sm:$0xff]  }
  0x34   :  { %v915_v37 = vld [vmem:[#allocation5 + $0xd4] ss:$8 sps:$4 sm:$0xff]   ;;  %v918_v39 = vld [vmem:[#allocation5 + $0xd0] ss:$8 sps:$4 sm:$0xff]   ;;  %v919_v40 = vld [vmem:[#allocation5 + $0x64] ss:$8 sps:$4 sm:$0xff]  }
  0x35   :  { %739 = vmatpush3.bf16.msra.mxu0 %v874_v7  ;;  %855 = vmatpush3.bf16.msra.mxu1 %v874_v7  ;;  %v921_v41 = vld [vmem:[#allocation5 + $0xe4] ss:$8 sps:$4 sm:$0xff]   ;;  %v923_v42 = vld [vmem:[#allocation5 + $0x60] ss:$8 sps:$4 sm:$0xff]   ;;  %v925_v44 = vld [vmem:[#allocation5 + $0x74] ss:$8 sps:$4 sm:$0xff]  }
  0x36   :  { %740 = vmatprep.subr.bf16.mxu0 %v875_v8  ;;  %848 = vmatprep.subr.bf16.mxu1 %v875_v8  ;;  %v924_v43 = vld [vmem:[#allocation5 + $0xe0] ss:$8 sps:$4 sm:$0xff]   ;;  %v927_v45 = vld [vmem:[#allocation5 + $0xf4] ss:$8 sps:$4 sm:$0xff]   ;;  %v929_v46 = vld [vmem:[#allocation5 + $0x70] ss:$8 sps:$4 sm:$0xff]  }
  0x37   :  { %v930_v47 = vld [vmem:[#allocation5 + $0xf0] ss:$8 sps:$4 sm:$0xff]   ;;  %v1060_v50 = vld [vmem:[%s1111_s2] ss:$0 sm:$0xff]  ;;  %s1009_s2 = smov [#allocation7]  }
  0x38   :  { %s670_s13 = sshll.u32 %s1009_s2, 4  ;;  %s671_s13 = int_to_ptr.vmem [resolvable:$true] %s670_s13 }
  0x39   :  { %741 = vmatpush3.bf16.msra.mxu0 %v876_v9  ;;  %856 = vmatpush3.bf16.msra.mxu1 %v876_v9  ;;  %s975_s14 = scalar_lea.vmem %s671_s13, 4096  ;;  %p980_p3 = scmp.lt.s32.totalorder %s671_s13, %s671_s13 }
  0x3a   :  { %742 = vmatprep.subr.bf16.mxu0 %v877_v10  ;;  %849 = vmatprep.subr.bf16.mxu1 %v877_v10  ;;  %p976_p2 = scmp.ne.s32.totalorder %s671_s13, %s975_s14  ;;  %p981_p4 = scmp.lt.s32.totalorder %s975_s14, %s975_s14 }
  0x3c   :  { %p982_p5 = por %p981_p4, %p980_p3 }
  0x3d   :  { %743 = vmatpush3.bf16.msra.mxu0 %v878_v13  ;;  %857 = vmatpush3.bf16.msra.mxu1 %v878_v13 }
  0x3e   :  { %744 = vmatprep.subr.bf16.mxu0 %v879_v14  ;;  %850 = vmatprep.subr.bf16.mxu1 %v879_v14  ;;  %p983_p6 = pnand %p982_p5, %p976_p2 }
  0x41   :  { %745 = vmatpush3.bf16.msra.mxu0 %v880_v15  ;;  %858 = vmatpush3.bf16.msra.mxu1 %v880_v15 }
  0x42   :  { %746 = vmatprep.subr.bf16.mxu0 %v881_v16  ;;  %851 = vmatprep.subr.bf16.mxu1 %v881_v16 }
  0x45   :  { %747 = vmatpush3.bf16.msra.mxu0 %v882_v17  ;;  %859 = vmatpush3.bf16.msra.mxu1 %v882_v17 }
  0x48   :  { %473 = vmatmul.mubr.bf16.vlgmr.msra.gmra.mrb[0].mxu0 %v883_v18  ;;  %537 = vmatmul.mubr.bf16.vlgmr.msra.gmra.mrb[0].mxu1 %v886_v19 }
  0x49   :  { %480 = vmatprep.mubr.bf16.mxu0 %v889_v20  ;;  %544 = vmatprep.mubr.bf16.mxu1 %v891_v21 }
  0x50   :  { %481 = vmatmul.mubr.bf16.gmra.mrb[4].mxu0 %v893_v22  ;;  %545 = vmatmul.mubr.bf16.gmra.mrb[4].mxu1 %v894_v23 }
  0x51   :  { %488 = vmatprep.mubr.bf16.mxu0 %v895_v24  ;;  %552 = vmatprep.mubr.bf16.mxu1 %v897_v25 }
  0x58   :  { %489 = vmatmul.mubr.bf16.gmra.mrb[8].mxu0 %v899_v26  ;;  %553 = vmatmul.mubr.bf16.gmra.mrb[8].mxu1 %v900_v27 }
  0x59   :  { %496 = vmatprep.mubr.bf16.mxu0 %v901_v28  ;;  %560 = vmatprep.mubr.bf16.mxu1 %v903_v29 }
  0x60   :  { %497 = vmatmul.mubr.bf16.gmra.mrb[12].mxu0 %v905_v30  ;;  %561 = vmatmul.mubr.bf16.gmra.mrb[12].mxu1 %v906_v31 }
  0x61   :  { %504 = vmatprep.mubr.bf16.mxu0 %v907_v32  ;;  %568 = vmatprep.mubr.bf16.mxu1 %v909_v33 }
  0x68   :  { %505 = vmatmul.mubr.bf16.gmra.mrb[16].mxu0 %v911_v34  ;;  %569 = vmatmul.mubr.bf16.gmra.mrb[16].mxu1 %v912_v35 }
  0x69   :  { %512 = vmatprep.mubr.bf16.mxu0 %v913_v36  ;;  %576 = vmatprep.mubr.bf16.mxu1 %v915_v37 }
  0x70   :  { %513 = vmatmul.mubr.bf16.gmra.mrb[20].mxu0 %v917_v38  ;;  %577 = vmatmul.mubr.bf16.gmra.mrb[20].mxu1 %v918_v39 }
  0x71   :  { %520 = vmatprep.mubr.bf16.mxu0 %v919_v40  ;;  %584 = vmatprep.mubr.bf16.mxu1 %v921_v41 }
  0x78   :  { %521 = vmatmul.mubr.bf16.gmra.mrb[24].mxu0 %v923_v42  ;;  %585 = vmatmul.mubr.bf16.gmra.mrb[24].mxu1 %v924_v43 }
  0x79   :  { %528 = vmatprep.mubr.bf16.mxu0 %v925_v44  ;;  %592 = vmatprep.mubr.bf16.mxu1 %v927_v45 }
  0x80   :  { %529 = vmatmul.mubr.bf16.gmra.mrb[28].mxu0 %v929_v46  ;;  %593 = vmatmul.mubr.bf16.gmra.mrb[28].mxu1 %v930_v47 }
 0x11b   :  { %v748_v48 = vpop.f32.mrb[0].mxu0  ;;  %v796_v49 = vpop.f32.mrb[0].mxu1 }
 0x11c   :  { %v749_v51 = vpop.f32.mrb[1].mxu0  ;;  %v797_v52 = vpop.f32.mrb[1].mxu1 }
 0x11d   :  { %v750_v53 = vadd.f32 %v749_v51, %v748_v48  ;;  %v798_v54 = vadd.f32 %v797_v52, %v796_v49  ;;  %v751_v55 = vpop.f32.mrb[2].mxu0  ;;  %v799_v56 = vpop.f32.mrb[2].mxu1 }
 0x11e   :  { %v752_v57 = vpop.f32.mrb[3].mxu0  ;;  %v800_v58 = vpop.f32.mrb[3].mxu1 }
 0x11f   :  { %v601_v59 = vadd.f32 %v750_v53, %v1060_v50  ;;  %v617_v60 = vadd.f32 %v798_v54, %v1060_v50  ;;  %v753_v61 = vadd.f32 %v752_v57, %v751_v55  ;;  %v801_v62 = vadd.f32 %v800_v58, %v799_v56 }
 0x121   :  { %633 = vst [vmem:[#allocation7] sm:$0xff] %v601_v59  ;;  %649 = vst [vmem:[#allocation7 + $0x80] sm:$0xff] %v617_v60  ;;  %v602_v63 = vadd.f32 %v753_v61, %v1060_v50  ;;  %v618_v0 = vadd.f32 %v801_v62, %v1060_v50 }
 0x123   :  { %634 = vst [vmem:[#allocation7 + $0x8] sm:$0xff] %v602_v63  ;;  %650 = vst [vmem:[#allocation7 + $0x88] sm:$0xff] %v618_v0  ;;  %v754_v1 = vpop.f32.mrb[4].mxu0  ;;  %v802_v2 = vpop.f32.mrb[4].mxu1 }
 0x124   :  { %v755_v3 = vpop.f32.mrb[5].mxu0  ;;  %v803_v4 = vpop.f32.mrb[5].mxu1 }
 0x125   :  { %v756_v5 = vadd.f32 %v755_v3, %v754_v1  ;;  %v804_v6 = vadd.f32 %v803_v4, %v802_v2  ;;  %v757_v7 = vpop.f32.mrb[6].mxu0  ;;  %v805_v8 = vpop.f32.mrb[6].mxu1 }
 0x126   :  { %v758_v9 = vpop.f32.mrb[7].mxu0  ;;  %v806_v10 = vpop.f32.mrb[7].mxu1 }
 0x127   :  { %v603_v11 = vadd.f32 %v756_v5, %v1060_v50  ;;  %v619_v12 = vadd.f32 %v804_v6, %v1060_v50  ;;  %v759_v13 = vadd.f32 %v758_v9, %v757_v7  ;;  %v807_v14 = vadd.f32 %v806_v10, %v805_v8 }
 0x129   :  { %635 = vst [vmem:[#allocation7 + $0x10] sm:$0xff] %v603_v11  ;;  %651 = vst [vmem:[#allocation7 + $0x90] sm:$0xff] %v619_v12  ;;  %v604_v15 = vadd.f32 %v759_v13, %v1060_v50  ;;  %v620_v16 = vadd.f32 %v807_v14, %v1060_v50 }
 0x12b   :  { %636 = vst [vmem:[#allocation7 + $0x18] sm:$0xff] %v604_v15  ;;  %652 = vst [vmem:[#allocation7 + $0x98] sm:$0xff] %v620_v16  ;;  %v760_v17 = vpop.f32.mrb[8].mxu0  ;;  %v808_v18 = vpop.f32.mrb[8].mxu1 }
 0x12c   :  { %v761_v19 = vpop.f32.mrb[9].mxu0  ;;  %v809_v20 = vpop.f32.mrb[9].mxu1 }
 0x12d   :  { %v762_v21 = vadd.f32 %v761_v19, %v760_v17  ;;  %v810_v22 = vadd.f32 %v809_v20, %v808_v18  ;;  %v763_v23 = vpop.f32.mrb[10].mxu0  ;;  %v811_v24 = vpop.f32.mrb[10].mxu1 }
 0x12e   :  { %v764_v25 = vpop.f32.mrb[11].mxu0  ;;  %v812_v26 = vpop.f32.mrb[11].mxu1 }
 0x12f   :  { %v605_v27 = vadd.f32 %v762_v21, %v1060_v50  ;;  %v621_v28 = vadd.f32 %v810_v22, %v1060_v50  ;;  %v765_v29 = vadd.f32 %v764_v25, %v763_v23  ;;  %v813_v30 = vadd.f32 %v812_v26, %v811_v24 }
 0x131   :  { %637 = vst [vmem:[#allocation7 + $0x20] sm:$0xff] %v605_v27  ;;  %653 = vst [vmem:[#allocation7 + $0xa0] sm:$0xff] %v621_v28  ;;  %v606_v31 = vadd.f32 %v765_v29, %v1060_v50  ;;  %v622_v32 = vadd.f32 %v813_v30, %v1060_v50 }
 0x133   :  { %638 = vst [vmem:[#allocation7 + $0x28] sm:$0xff] %v606_v31  ;;  %654 = vst [vmem:[#allocation7 + $0xa8] sm:$0xff] %v622_v32  ;;  %v766_v33 = vpop.f32.mrb[12].mxu0  ;;  %v814_v34 = vpop.f32.mrb[12].mxu1 }
 0x134   :  { %v767_v35 = vpop.f32.mrb[13].mxu0  ;;  %v815_v36 = vpop.f32.mrb[13].mxu1 }
 0x135   :  { %v768_v37 = vadd.f32 %v767_v35, %v766_v33  ;;  %v816_v38 = vadd.f32 %v815_v36, %v814_v34  ;;  %v769_v39 = vpop.f32.mrb[14].mxu0  ;;  %v817_v40 = vpop.f32.mrb[14].mxu1 }
 0x136   :  { %v770_v41 = vpop.f32.mrb[15].mxu0  ;;  %v818_v42 = vpop.f32.mrb[15].mxu1 }
 0x137   :  { %v607_v43 = vadd.f32 %v768_v37, %v1060_v50  ;;  %v623_v44 = vadd.f32 %v816_v38, %v1060_v50  ;;  %v771_v45 = vadd.f32 %v770_v41, %v769_v39  ;;  %v819_v46 = vadd.f32 %v818_v42, %v817_v40 }
 0x139   :  { %639 = vst [vmem:[#allocation7 + $0x30] sm:$0xff] %v607_v43  ;;  %655 = vst [vmem:[#allocation7 + $0xb0] sm:$0xff] %v623_v44  ;;  %v608_v47 = vadd.f32 %v771_v45, %v1060_v50  ;;  %v624_v48 = vadd.f32 %v819_v46, %v1060_v50 }
 0x13b   :  { %640 = vst [vmem:[#allocation7 + $0x38] sm:$0xff] %v608_v47  ;;  %656 = vst [vmem:[#allocation7 + $0xb8] sm:$0xff] %v624_v48  ;;  %v772_v49 = vpop.f32.mrb[16].mxu0  ;;  %v820_v51 = vpop.f32.mrb[16].mxu1 }
 0x13c   :  { %v773_v52 = vpop.f32.mrb[17].mxu0  ;;  %v821_v53 = vpop.f32.mrb[17].mxu1 }
 0x13d   :  { %v774_v54 = vadd.f32 %v773_v52, %v772_v49  ;;  %v822_v55 = vadd.f32 %v821_v53, %v820_v51  ;;  %v775_v56 = vpop.f32.mrb[18].mxu0  ;;  %v823_v57 = vpop.f32.mrb[18].mxu1 }
 0x13e   :  { %v776_v58 = vpop.f32.mrb[19].mxu0  ;;  %v824_v59 = vpop.f32.mrb[19].mxu1 }
 0x13f   :  { %v609_v60 = vadd.f32 %v774_v54, %v1060_v50  ;;  %v625_v61 = vadd.f32 %v822_v55, %v1060_v50  ;;  %v777_v62 = vadd.f32 %v776_v58, %v775_v56  ;;  %v825_v63 = vadd.f32 %v824_v59, %v823_v57 }
 0x141   :  { %641 = vst [vmem:[#allocation7 + $0x40] sm:$0xff] %v609_v60  ;;  %657 = vst [vmem:[#allocation7 + $0xc0] sm:$0xff] %v625_v61  ;;  %v610_v0 = vadd.f32 %v777_v62, %v1060_v50  ;;  %v626_v1 = vadd.f32 %v825_v63, %v1060_v50 }
 0x143   :  { %642 = vst [vmem:[#allocation7 + $0x48] sm:$0xff] %v610_v0  ;;  %658 = vst [vmem:[#allocation7 + $0xc8] sm:$0xff] %v626_v1  ;;  %v778_v2 = vpop.f32.mrb[20].mxu0  ;;  %v826_v3 = vpop.f32.mrb[20].mxu1 }
 0x144   :  { %v779_v4 = vpop.f32.mrb[21].mxu0  ;;  %v827_v5 = vpop.f32.mrb[21].mxu1 }
 0x145   :  { %v780_v6 = vadd.f32 %v779_v4, %v778_v2  ;;  %v828_v7 = vadd.f32 %v827_v5, %v826_v3  ;;  %v781_v8 = vpop.f32.mrb[22].mxu0  ;;  %v829_v9 = vpop.f32.mrb[22].mxu1 }
 0x146   :  { %v782_v10 = vpop.f32.mrb[23].mxu0  ;;  %v830_v11 = vpop.f32.mrb[23].mxu1 }
 0x147   :  { %v611_v12 = vadd.f32 %v780_v6, %v1060_v50  ;;  %v627_v13 = vadd.f32 %v828_v7, %v1060_v50  ;;  %v783_v14 = vadd.f32 %v782_v10, %v781_v8  ;;  %v831_v15 = vadd.f32 %v830_v11, %v829_v9 }
 0x149   :  { %643 = vst [vmem:[#allocation7 + $0x50] sm:$0xff] %v611_v12  ;;  %659 = vst [vmem:[#allocation7 + $0xd0] sm:$0xff] %v627_v13  ;;  %v612_v16 = vadd.f32 %v783_v14, %v1060_v50  ;;  %v628_v17 = vadd.f32 %v831_v15, %v1060_v50 }
 0x14b   :  { %644 = vst [vmem:[#allocation7 + $0x58] sm:$0xff] %v612_v16  ;;  %660 = vst [vmem:[#allocation7 + $0xd8] sm:$0xff] %v628_v17  ;;  %v784_v18 = vpop.f32.mrb[24].mxu0  ;;  %v832_v19 = vpop.f32.mrb[24].mxu1 }
 0x14c   :  { %v785_v20 = vpop.f32.mrb[25].mxu0  ;;  %v833_v21 = vpop.f32.mrb[25].mxu1 }
 0x14d   :  { %v786_v22 = vadd.f32 %v785_v20, %v784_v18  ;;  %v834_v23 = vadd.f32 %v833_v21, %v832_v19  ;;  %v787_v24 = vpop.f32.mrb[26].mxu0  ;;  %v835_v25 = vpop.f32.mrb[26].mxu1 }
 0x14e   :  { %v788_v26 = vpop.f32.mrb[27].mxu0  ;;  %v836_v27 = vpop.f32.mrb[27].mxu1 }
 0x14f   :  { %v613_v28 = vadd.f32 %v786_v22, %v1060_v50  ;;  %v629_v29 = vadd.f32 %v834_v23, %v1060_v50  ;;  %v789_v30 = vadd.f32 %v788_v26, %v787_v24  ;;  %v837_v31 = vadd.f32 %v836_v27, %v835_v25 }
 0x151   :  { %645 = vst [vmem:[#allocation7 + $0x60] sm:$0xff] %v613_v28  ;;  %661 = vst [vmem:[#allocation7 + $0xe0] sm:$0xff] %v629_v29  ;;  %v614_v32 = vadd.f32 %v789_v30, %v1060_v50  ;;  %v630_v33 = vadd.f32 %v837_v31, %v1060_v50 }
 0x153   :  { %646 = vst [vmem:[#allocation7 + $0x68] sm:$0xff] %v614_v32  ;;  %662 = vst [vmem:[#allocation7 + $0xe8] sm:$0xff] %v630_v33  ;;  %v790_v34 = vpop.f32.mrb[28].mxu0  ;;  %v838_v35 = vpop.f32.mrb[28].mxu1 }
 0x154   :  { %v791_v36 = vpop.f32.mrb[29].mxu0  ;;  %v839_v37 = vpop.f32.mrb[29].mxu1 }
 0x155   :  { %v792_v38 = vadd.f32 %v791_v36, %v790_v34  ;;  %v840_v39 = vadd.f32 %v839_v37, %v838_v35  ;;  %v793_v40 = vpop.f32.mrb[30].mxu0  ;;  %v841_v41 = vpop.f32.mrb[30].mxu1 }
 0x156   :  { %v794_v42 = vpop.f32.mrb[31].mxu0  ;;  %v842_v43 = vpop.f32.mrb[31].mxu1 }
 0x157   :  { %v615_v44 = vadd.f32 %v792_v38, %v1060_v50  ;;  %v631_v45 = vadd.f32 %v840_v39, %v1060_v50  ;;  %v795_v46 = vadd.f32 %v794_v42, %v793_v40  ;;  %v843_v47 = vadd.f32 %v842_v43, %v841_v41 }
 0x159   :  { %647 = vst [vmem:[#allocation7 + $0x70] sm:$0xff] %v615_v44  ;;  %663 = vst [vmem:[#allocation7 + $0xf0] sm:$0xff] %v631_v45  ;;  %v616_v48 = vadd.f32 %v795_v46, %v1060_v50  ;;  %v632_v49 = vadd.f32 %v843_v47, %v1060_v50 }
 0x15b   :  { %648 = vst [vmem:[#allocation7 + $0x78] sm:$0xff] %v616_v48  ;;  %664 = vst [vmem:[#allocation7 + $0xf8] sm:$0xff] %v632_v49 }
 0x15c   :  { %986 = shalt.err (!%p983_p6)
}
 0x15d   :  { %s987_s17 = scalar_lea.hbm %s1112_s3, 4096 }
 0x15e   :  { %p988_p7 = scmp.ne.s32.totalorder %s1112_s3, %s987_s17  ;;  %p991_p8 = scmp.lt.u32.totalorder %s987_s17, %s1112_s3 }
 0x160   :  { %p993_p9 = pnand %p991_p8, %p988_p7 }
 0x162   :  { %996 = shalt.err (!%p993_p9)
}
 0x163   :  { %676 = dma.vmem_to_hbm [thread:$0]  %s671_s13, 4096, %s1112_s3, [#allocation4], %s1007_s0, %s1007_s0, %s1008_s9  }
 0x164   :  { %1001 = dma.done.wait [#allocation4], 4096  }
 0x165   :  { %1002 = vsyncadd [#allocation4], 4294963200 }
 0x166   :  { %680 = vsyncpa [#allocation3], 1 }
 0x167   :  { %681 = vsyncpa [#allocation6], 1 }
 0x168   :  { %682 = vsyncpa [#allocation4], 1 }

</bundles_post_ra>
